<compile_context>
chip_gen: v7x
topology: tpu7x:2x2x1
jax: 0.10.0
libtpu: 0.0.40
codegen_flags: <defaults>
</compile_context>

<pallas_src>
import functools

import jax
import jax.numpy as jnp
from jax.experimental import pallas as pl
from jax.experimental.pallas import tpu as pltpu


def _combined_loss_kernel(logits_ref, tgt_ref, out_ref,
                          acc_ce_ref, acc_focal_ref, acc_cnt_ref,
                          *, alpha, gamma, ignore_index, total_pixels):
    first = (pl.program_id(0) == 0) & (pl.program_id(1) == 0)
    last = ((pl.program_id(0) == pl.num_programs(0) - 1)
            & (pl.program_id(1) == pl.num_programs(1) - 1))

    @pl.when(first)
    def _():
        acc_ce_ref[...] = jnp.zeros_like(acc_ce_ref)
        acc_focal_ref[...] = jnp.zeros_like(acc_focal_ref)
        acc_cnt_ref[...] = jnp.zeros_like(acc_cnt_ref)

    logits = logits_ref[...].astype(jnp.float32)        # (C, TP)  classes x pixels
    tgt = tgt_ref[...]                                   # (1, TP)  int32

    # Numerically-stable softmax cross-entropy, reduced over the class
    # (sublane) axis; pixels stay dense on the lane axis.
    m = jnp.max(logits, axis=0, keepdims=True)           # (1, TP)
    shifted = logits - m                                 # (C, TP)
    lse = jnp.log(jnp.sum(jnp.exp(shifted), axis=0, keepdims=True))  # (1, TP)

    cls = jax.lax.broadcasted_iota(jnp.int32, shifted.shape, 0)      # (C, TP)
    tgt_logit = jnp.sum(jnp.where(cls == tgt, shifted, 0.0),
                        axis=0, keepdims=True)           # (1, TP)

    valid = (tgt != ignore_index).astype(jnp.float32)    # (1, TP)
    ce = (lse - tgt_logit) * valid                       # 0 at ignored pixels

    # Focal term: pt = exp(-ce); (1 - pt)^gamma * ce.
    pt = jnp.exp(-ce)
    one_minus_pt = jnp.maximum(1.0 - pt, 0.0)            # clamp fp-rounding negatives
    if float(gamma) == 2.0:
        w = one_minus_pt * one_minus_pt
    elif float(gamma) == 1.0:
        w = one_minus_pt
    else:
        w = jnp.power(one_minus_pt, jnp.float32(gamma))
    focal = w * ce

    # Tile-independent scalar accumulators (single lane reduce per step).
    acc_ce_ref[...] += jnp.sum(ce, axis=1, keepdims=True)        # (1, 1)
    acc_focal_ref[...] += jnp.sum(focal, axis=1, keepdims=True)  # (1, 1)
    acc_cnt_ref[...] += jnp.sum(valid, axis=1, keepdims=True)    # (1, 1)

    @pl.when(last)
    def _():
        # CE mean over valid pixels (torch CrossEntropyLoss with ignore_index).
        ce_mean = acc_ce_ref[...] / acc_cnt_ref[...]
        # Focal mean over ALL pixels (torch .mean() after reduction='none').
        focal_mean = acc_focal_ref[...] * (1.0 / jnp.float32(total_pixels))
        out_ref[...] = (jnp.float32(alpha) * ce_mean
                        + jnp.float32(1.0 - alpha) * focal_mean)


def combined_loss(inputs, targets, *, ignore_index=0, alpha=0.7, gamma=2.0,
                  tile=4096):
    """inputs: (N, C, H, W) float logits; targets: (N, H, W) int class ids.

    TODO(synk): optional per-class CE weights (class_weights) not implemented;
    the reference module defaults them to None.
    """
    N, C, H, W = inputs.shape
    HW = H * W
    P = N * HW

    # Native layout, no transpose: classes on sublane axis, pixels on lanes.
    logits = inputs.reshape(N, C, HW)
    tgt = targets.reshape(N, 1, HW).astype(jnp.int32)

    # Pixel-tile size: multiple of 128 lanes, capped by tile and by HW.
    tile = max(128, (int(tile) // 128) * 128)
    hw128 = ((HW + 127) // 128) * 128
    tile_p = min(tile, hw128)
    hw_pad = ((HW + tile_p - 1) // tile_p) * tile_p
    if hw_pad != HW:
        # Padded pixels carry ignore_index targets -> contribute nothing.
        logits = jnp.pad(logits, ((0, 0), (0, 0), (0, hw_pad - HW)))
        tgt = jnp.pad(tgt, ((0, 0), (0, 0), (0, hw_pad - HW)),
                      constant_values=ignore_index)

    kernel = functools.partial(
        _combined_loss_kernel,
        alpha=float(alpha), gamma=float(gamma),
        ignore_index=int(ignore_index), total_pixels=int(P))

    out = pl.pallas_call(
        kernel,
        out_shape=jax.ShapeDtypeStruct((1, 1), jnp.float32),
        grid_spec=pltpu.PrefetchScalarGridSpec(
            num_scalar_prefetch=0,
            grid=(N, hw_pad // tile_p),
            in_specs=[
                # logits tile: (C, tile_p), batch dim squeezed away.
                pl.BlockSpec((None, C, tile_p), lambda n, p: (n, 0, p)),
                # targets tile: (1, tile_p), lane-dense int32.
                pl.BlockSpec((None, 1, tile_p), lambda n, p: (n, 0, p)),
            ],
            out_specs=pl.BlockSpec((1, 1), lambda n, p: (0, 0)),
            scratch_shapes=[pltpu.VMEM((1, 1), jnp.float32)] * 3,
        ),
        compiler_params=pltpu.CompilerParams(
            dimension_semantics=("arbitrary", "arbitrary")),
    )(logits, tgt)
    return out[0, 0]


def _reference_loss(inputs, targets, *, ignore_index=0, alpha=0.7, gamma=2.0):
    """Pure-JAX reference mirroring the PyTorch module."""
    N, C, H, W = inputs.shape
    logits = jnp.transpose(inputs, (0, 2, 3, 1)).reshape(-1, C).astype(jnp.float32)
    tgt = targets.reshape(-1)
    lse = jax.nn.logsumexp(logits, axis=-1)
    tl = jnp.take_along_axis(logits, tgt[:, None], axis=-1)[:, 0]
    ce = lse - tl
    valid = tgt != ignore_index
    ce = jnp.where(valid, ce, 0.0)
    ce_mean = jnp.sum(ce) / jnp.sum(valid)
    pt = jnp.exp(-ce)
    focal_mean = jnp.mean((1.0 - pt) ** gamma * ce)
    return alpha * ce_mean + (1.0 - alpha) * focal_mean


if __name__ == "__main__":
    # Small shapes: batch=2, num_classes=8, spatial=16x16.
    key = jax.random.PRNGKey(0)
    k_logits, k_tgt = jax.random.split(key)
    num_classes = 8
    inputs = jax.random.normal(k_logits, (2, num_classes, 16, 16), dtype=jnp.float32)
    targets = jax.random.randint(k_tgt, (2, 16, 16), 0, num_classes, dtype=jnp.int32)

    loss = combined_loss(inputs, targets, ignore_index=0, alpha=0.7, gamma=2.0)
    loss = jax.block_until_ready(loss)

    ref = jax.block_until_ready(
        _reference_loss(inputs, targets, ignore_index=0, alpha=0.7, gamma=2.0))
    assert jnp.abs(loss - ref) < 1e-4, (loss, ref)

    print("KERNEL_OK")
</pallas_src>

<mosaic_0001>
module attributes {stable_mosaic.version = 11 : i64} {
  func.func @_combined_loss_kernel(%arg0: i32, %arg1: i32, %arg2: memref<1x8x256xf32, #tpu.memory_space<vmem>>, %arg3: memref<1x1x256xi32, #tpu.memory_space<vmem>>, %arg4: memref<1x1xf32, #tpu.memory_space<vmem>>, %arg5: memref<1x1xf32, #tpu.memory_space<vmem>>, %arg6: memref<1x1xf32, #tpu.memory_space<vmem>>, %arg7: memref<1x1xf32, #tpu.memory_space<vmem>>) attributes {dimension_semantics = [#tpu.dimension_semantics<arbitrary>, #tpu.dimension_semantics<arbitrary>], iteration_bounds = array<i64: 2, 1>, scalar_prefetch = 0 : i64, scratch_operands = 3 : i64, tpu.core_type = #tpu.core_type<tc>, window_params = [{transform_indices = @transform_0, window_bounds = array<i64: 1, 8, 256>}, {transform_indices = @transform_1, window_bounds = array<i64: 1, 1, 256>}, {pipeline_mode = #tpu.pipeline_mode<synchronous>, transform_indices = @transform_2, window_bounds = array<i64: 1, 1>}]} {
    %c0_i32 = arith.constant 0 : i32
    %0 = arith.cmpi eq, %arg0, %c0_i32 : i32
    %c0_i32_0 = arith.constant 0 : i32
    %1 = arith.cmpi eq, %arg1, %c0_i32_0 : i32
    %2 = arith.andi %0, %1 : i1
    %c1_i32 = arith.constant 1 : i32
    %3 = arith.cmpi eq, %arg0, %c1_i32 : i32
    %c0_i32_1 = arith.constant 0 : i32
    %4 = arith.cmpi eq, %arg1, %c0_i32_1 : i32
    %5 = arith.andi %3, %4 : i1
    %6 = arith.extui %2 : i1 to i32
    %c0_i32_2 = arith.constant 0 : i32
    %7 = arith.cmpi ne, %6, %c0_i32_2 : i32
    scf.if %7 {
      %cst_31 = arith.constant 0.000000e+00 : f32
      %59 = vector.broadcast %cst_31 : f32 to vector<1x1xf32>
      %c0_32 = arith.constant 0 : index
      %c0_33 = arith.constant 0 : index
      %60 = vector.load %arg5[%c0_32, %c0_33] : memref<1x1xf32, #tpu.memory_space<vmem>>, vector<1x1xf32>
      tpu.vector_store %arg5[%c0_32, %c0_33], %59 {strides = array<i32>} : memref<1x1xf32, #tpu.memory_space<vmem>>, vector<1x1xf32>,
      %cst_34 = arith.constant 0.000000e+00 : f32
      %61 = vector.broadcast %cst_34 : f32 to vector<1x1xf32>
      %c0_35 = arith.constant 0 : index
      %c0_36 = arith.constant 0 : index
      %62 = vector.load %arg6[%c0_35, %c0_36] : memref<1x1xf32, #tpu.memory_space<vmem>>, vector<1x1xf32>
      tpu.vector_store %arg6[%c0_35, %c0_36], %61 {strides = array<i32>} : memref<1x1xf32, #tpu.memory_space<vmem>>, vector<1x1xf32>,
      %cst_37 = arith.constant 0.000000e+00 : f32
      %63 = vector.broadcast %cst_37 : f32 to vector<1x1xf32>
      %c0_38 = arith.constant 0 : index
      %c0_39 = arith.constant 0 : index
      %64 = vector.load %arg7[%c0_38, %c0_39] : memref<1x1xf32, #tpu.memory_space<vmem>>, vector<1x1xf32>
      tpu.vector_store %arg7[%c0_38, %c0_39], %63 {strides = array<i32>} : memref<1x1xf32, #tpu.memory_space<vmem>>, vector<1x1xf32>,
    } else {
    }
    %c0 = arith.constant 0 : index
    %c0_3 = arith.constant 0 : index
    %c0_4 = arith.constant 0 : index
    %8 = vector.load %arg2[%c0, %c0_3, %c0_4] : memref<1x8x256xf32, #tpu.memory_space<vmem>>, vector<1x8x256xf32>
    %9 = vector.shape_cast %8 : vector<1x8x256xf32> to vector<8x256xf32>
    %c0_5 = arith.constant 0 : index
    %c0_6 = arith.constant 0 : index
    %c0_7 = arith.constant 0 : index
    %10 = vector.load %arg3[%c0_5, %c0_6, %c0_7] : memref<1x1x256xi32, #tpu.memory_space<vmem>>, vector<1x1x256xi32>
    %11 = vector.shape_cast %10 : vector<1x1x256xi32> to vector<1x256xi32>
    %cst = arith.constant dense<0xFF800000> : vector<256xf32>
    %12 = vector.multi_reduction <maximumf>, %9, %cst [0] : vector<8x256xf32> to vector<256xf32>
    %13 = vector.shape_cast %12 : vector<256xf32> to vector<1x256xf32>
    %14 = vector.broadcast %13 : vector<1x256xf32> to vector<8x256xf32>
    %15 = arith.subf %9, %14 : vector<8x256xf32>
    %16 = math.exp %15 : vector<8x256xf32>
    %cst_8 = arith.constant dense<0.000000e+00> : vector<256xf32>
    %17 = vector.multi_reduction <add>, %16, %cst_8 [0] : vector<8x256xf32> to vector<256xf32>
    %18 = vector.shape_cast %17 : vector<256xf32> to vector<1x256xf32>
    %19 = math.log %18 : vector<1x256xf32>
    %20 = tpu.iota {dimensions = array<i32: 0>} : vector<8x256xi32>
    %21 = vector.broadcast %11 : vector<1x256xi32> to vector<8x256xi32>
    %22 = arith.cmpi eq, %20, %21 : vector<8x256xi32>
    %cst_9 = arith.constant 0.000000e+00 : f32
    %23 = vector.broadcast %cst_9 : f32 to vector<8x256xf32>
    %24 = arith.select %22, %15, %23 : vector<8x256xi1>, vector<8x256xf32>
    %cst_10 = arith.constant dense<0.000000e+00> : vector<256xf32>
    %25 = vector.multi_reduction <add>, %24, %cst_10 [0] : vector<8x256xf32> to vector<256xf32>
    %26 = vector.shape_cast %25 : vector<256xf32> to vector<1x256xf32>
    %c0_i32_11 = arith.constant 0 : i32
    %27 = vector.broadcast %c0_i32_11 : i32 to vector<1x256xi32>
    %28 = arith.cmpi ne, %11, %27 : vector<1x256xi32>
    %29 = arith.extui %28 : vector<1x256xi1> to vector<1x256xi32>
    %30 = arith.sitofp %29 : vector<1x256xi32> to vector<1x256xf32>
    %31 = arith.subf %19, %26 : vector<1x256xf32>
    %32 = arith.mulf %31, %30 : vector<1x256xf32>
    %cst_12 = arith.constant 0.000000e+00 : f32
    %33 = vector.broadcast %cst_12 : f32 to vector<1x256xf32>
    %34 = arith.subf %33, %32 : vector<1x256xf32>
    %35 = math.exp %34 : vector<1x256xf32>
    %cst_13 = arith.constant 1.000000e+00 : f32
    %36 = vector.broadcast %cst_13 : f32 to vector<1x256xf32>
    %37 = arith.subf %36, %35 : vector<1x256xf32>
    %cst_14 = arith.constant 0.000000e+00 : f32
    %38 = vector.broadcast %cst_14 : f32 to vector<1x256xf32>
    %39 = arith.maximumf %37, %38 : vector<1x256xf32>
    %40 = arith.mulf %39, %39 : vector<1x256xf32>
    %41 = arith.mulf %40, %32 : vector<1x256xf32>
    %c0_15 = arith.constant 0 : index
    %c0_16 = arith.constant 0 : index
    %42 = vector.load %arg5[%c0_15, %c0_16] : memref<1x1xf32, #tpu.memory_space<vmem>>, vector<1x1xf32>
    %cst_17 = arith.constant dense<0.000000e+00> : vector<1xf32>
    %43 = vector.multi_reduction <add>, %32, %cst_17 [1] : vector<1x256xf32> to vector<1xf32>
    %44 = vector.shape_cast %43 : vector<1xf32> to vector<1x1xf32>
    %45 = arith.addf %42, %44 : vector<1x1xf32>
    %c0_18 = arith.constant 0 : index
    %c0_19 = arith.constant 0 : index
    %46 = vector.load %arg5[%c0_18, %c0_19] : memref<1x1xf32, #tpu.memory_space<vmem>>, vector<1x1xf32>
    tpu.vector_store %arg5[%c0_18, %c0_19], %45 {strides = array<i32>} : memref<1x1xf32, #tpu.memory_space<vmem>>, vector<1x1xf32>,
    %c0_20 = arith.constant 0 : index
    %c0_21 = arith.constant 0 : index
    %47 = vector.load %arg6[%c0_20, %c0_21] : memref<1x1xf32, #tpu.memory_space<vmem>>, vector<1x1xf32>
    %cst_22 = arith.constant dense<0.000000e+00> : vector<1xf32>
    %48 = vector.multi_reduction <add>, %41, %cst_22 [1] : vector<1x256xf32> to vector<1xf32>
    %49 = vector.shape_cast %48 : vector<1xf32> to vector<1x1xf32>
    %50 = arith.addf %47, %49 : vector<1x1xf32>
    %c0_23 = arith.constant 0 : index
    %c0_24 = arith.constant 0 : index
    %51 = vector.load %arg6[%c0_23, %c0_24] : memref<1x1xf32, #tpu.memory_space<vmem>>, vector<1x1xf32>
    tpu.vector_store %arg6[%c0_23, %c0_24], %50 {strides = array<i32>} : memref<1x1xf32, #tpu.memory_space<vmem>>, vector<1x1xf32>,
    %c0_25 = arith.constant 0 : index
    %c0_26 = arith.constant 0 : index
    %52 = vector.load %arg7[%c0_25, %c0_26] : memref<1x1xf32, #tpu.memory_space<vmem>>, vector<1x1xf32>
    %cst_27 = arith.constant dense<0.000000e+00> : vector<1xf32>
    %53 = vector.multi_reduction <add>, %30, %cst_27 [1] : vector<1x256xf32> to vector<1xf32>
    %54 = vector.shape_cast %53 : vector<1xf32> to vector<1x1xf32>
    %55 = arith.addf %52, %54 : vector<1x1xf32>
    %c0_28 = arith.constant 0 : index
    %c0_29 = arith.constant 0 : index
    %56 = vector.load %arg7[%c0_28, %c0_29] : memref<1x1xf32, #tpu.memory_space<vmem>>, vector<1x1xf32>
    tpu.vector_store %arg7[%c0_28, %c0_29], %55 {strides = array<i32>} : memref<1x1xf32, #tpu.memory_space<vmem>>, vector<1x1xf32>,
    %57 = arith.extui %5 : i1 to i32
    %c0_i32_30 = arith.constant 0 : i32
    %58 = arith.cmpi ne, %57, %c0_i32_30 : i32
    scf.if %58 {
      %c0_31 = arith.constant 0 : index
      %c0_32 = arith.constant 0 : index
      %59 = vector.load %arg5[%c0_31, %c0_32] : memref<1x1xf32, #tpu.memory_space<vmem>>, vector<1x1xf32>
      %c0_33 = arith.constant 0 : index
      %c0_34 = arith.constant 0 : index
      %60 = vector.load %arg7[%c0_33, %c0_34] : memref<1x1xf32, #tpu.memory_space<vmem>>, vector<1x1xf32>
      %61 = arith.divf %59, %60 : vector<1x1xf32>
      %c0_35 = arith.constant 0 : index
      %c0_36 = arith.constant 0 : index
      %62 = vector.load %arg6[%c0_35, %c0_36] : memref<1x1xf32, #tpu.memory_space<vmem>>, vector<1x1xf32>
      %cst_37 = arith.constant 1.000000e+00 : f32
      %cst_38 = arith.constant 5.120000e+02 : f32
      %63 = arith.divf %cst_37, %cst_38 : f32
      %64 = vector.broadcast %63 : f32 to vector<1x1xf32>
      %65 = arith.mulf %62, %64 : vector<1x1xf32>
      %cst_39 = arith.constant 0.699999988 : f32
      %66 = vector.broadcast %cst_39 : f32 to vector<1x1xf32>
      %67 = arith.mulf %66, %61 : vector<1x1xf32>
      %cst_40 = arith.constant 3.000000e-01 : f32
      %68 = vector.broadcast %cst_40 : f32 to vector<1x1xf32>
      %69 = arith.mulf %68, %65 : vector<1x1xf32>
      %70 = arith.addf %67, %69 : vector<1x1xf32>
      %c0_41 = arith.constant 0 : index
      %c0_42 = arith.constant 0 : index
      %71 = vector.load %arg4[%c0_41, %c0_42] : memref<1x1xf32, #tpu.memory_space<vmem>>, vector<1x1xf32>
      tpu.vector_store %arg4[%c0_41, %c0_42], %70 {strides = array<i32>} : memref<1x1xf32, #tpu.memory_space<vmem>>, vector<1x1xf32>,
    } else {
    }
    return
  }
  func.func @transform_0(%arg0: i32, %arg1: i32) -> (i32, i32, i32) {
    %c0_i32 = arith.constant 0 : i32
    %c0_i32_0 = arith.constant 0 : i32
    return %arg0, %c0_i32, %arg1 : i32, i32, i32
  }
  func.func @transform_1(%arg0: i32, %arg1: i32) -> (i32, i32, i32) {
    %c0_i32 = arith.constant 0 : i32
    %c0_i32_0 = arith.constant 0 : i32
    return %arg0, %c0_i32, %arg1 : i32, i32, i32
  }
  func.func @transform_2(%arg0: i32, %arg1: i32) -> (i32, i32) {
    %c0_i32 = arith.constant 0 : i32
    %c0_i32_0 = arith.constant 0 : i32
    %c0_i32_1 = arith.constant 0 : i32
    return %c0_i32, %c0_i32_0 : i32, i32
  }
}

</mosaic_0001>

<bundles_post_ra>
// kernel: tpu_custom_call.1
= control target key start
LH: loop header
LB: loop body
LE: loop exit
PB: predicated region body
PF: predicated region fallthrough
CT: control target
= control target key end

     0   :  { %7 = vsyncpa [#allocation6], 0  ;;  %s926_s0 = inlined_call_operand.hbm [shape: f32[2,8,256], index: 0, kind: input, shape index: {}]   ;;  %s927_s1 = inlined_call_operand.hbm [shape: s32[2,1,256], index: 1, kind: input, shape index: {}]   ;;  %s928_s2 = inlined_call_operand.hbm [shape: f32[1,1], index: 2, kind: output, shape index: {}]  }
   0x1   :  { %9 = vsyncpa [#allocation6 + $0x1], 0 }
   0x2   :  { %10 = vsyncpa [#allocation9], 0 }
   0x3   :  { %12 = vsyncpa [#allocation9 + $0x1], 0 }
   0x4   :  { %13 = vsyncpa [#allocation7], 0  ;;  %s721_s9 = smov 0   ;;  %s723_s10 = smov 0  }
   0x5   :  { %s725_s11 = smov 0   ;;  %s727_s12 = smov 0  }
   0x6   :  { %s729_s13 = smov 0   ;;  %s731_s14 = smov 0  }
   0x7 LB: > { %s449_s15 = sadd.s32 4294967295, %s699_s14   ;;  %s31_s16 = sadd.s32 1, %s695_s13  ;;  %s699_s14 = sphi %s731_s14, %s19_s14   ;;  %s695_s13 = sphi %s729_s13, %s943_s13   ;;  %s691_s12 = sphi %s727_s12, %s942_s12   ;;  %s687_s11 = sphi %s725_s11, %s941_s11   ;;  %s683_s10 = sphi %s723_s10, %s940_s10   ;;  %s679_s9 = sphi %s721_s9, %s939_s9  }
   0x8   : > { %p33_p0 = scmp.ge.s32.totalorder %s31_s16, 2  ;;  %s40_s17 = sadd.s32 1, %s687_s11 }
   0x9   : > { %p47_p1 = scmp.ne.s32.totalorder %s687_s11, %s683_s10  ;;  %p48_p2 = scmp.eq.s32.totalorder %s699_s14, 0 }
   0xa   : > { %s945_s16 = smov (%p33_p0, %s31_s16), 0  ;;  %p53_p4 = scmp.ne.s32.totalorder %s683_s10, %s679_s9 }
   0xb   : > { %p757_p3 = por %p48_p2, %p47_p1  ;;  %s35_s19 = ssub.s32 %s695_s13, %s945_s16 }
   0xc   : > { %p54_p5 = scmp.eq.s32.totalorder %s449_s15, 0  ;;  %p38_p6 = scmp.eq.s32.totalorder %s35_s19, 0 }
   0xd   : > { %p487_p8 = scmp.lt.s32.totalorder %s699_s14, 2  ;;  %s775_s22 = sand.u32 1, %s687_s11  }
   0xe   : > { %p766_p7 = por %p54_p5, %p53_p4  ;;  %s468_s23 = sshll.u32 %s695_s13, 8 }
   0xf   : > { %s772_s21 = scalar_select %p38_p6, %s687_s11, %s40_s17  }
  0x10   : > { %s931_s20 = scalar_select %p766_p7, 1, 0 }
  0x11   : > { %s452_s24 = sshll.u32 %s775_s22, 4  ;;  %s782_s27 = scalar_lea.hbm %s926_s0, %s468_s23 }
  0x12   : > { %s130_s28 = scalar_lea.vmem [#allocation5], %s452_s24  ;;  %p786_p9 = pnand %p487_p8, %p757_p3 }
  0x13   : > { %s140_s29 = sshll.u32 %s130_s28, 4  ;;  %s127_s3 = scalar_lea.sflag [#allocation6], %s775_s22  ;;  %s790_s29 = int_to_ptr.vmem [resolvable:$true] %s140_s29 }
  0x14   : > { %s555_s4 = scalar_lea.hbm %s782_s27, 256  ;;  %p557_p13 = pneg %p786_p9 }
  0x15   : > { %p556_p12 = scmp.ne.s32.totalorder %s782_s27, %s555_s4  ;;  %s560_s7 = scalar_lea.hbm %s926_s0, 512 }
  0x16   : > { %p561_p2 = scmp.lt.u32.totalorder %s782_s27, %s926_s0  ;;  %p562_p3 = scmp.lt.u32.totalorder %s560_s7, %s555_s4 }
  0x17   : > { %p558_p0 = pnand %p557_p13, %p556_p12  ;;  %p564_p5 = scmp.lt.u32.totalorder %s555_s4, %s782_s27 }
  0x18   : > { %p563_p4 = por %p562_p3, %p561_p2 }
  0x19   : > { %p559_p1 = pneg %p558_p0 }
  0x1a   : > { %p565_p6 = por %p564_p5, %p563_p4 }
  0x1c   : > { %p566_p8 = pnand %p565_p6, %p559_p1 }
  0x1e   : > { %569 = shalt.err (!%p566_p8)
}
  0x1f   : > { %s570_s17 = scalar_lea.vmem %s790_s29, 256  ;;  %s701_s18 = smov [#allocation5]  }
  0x20   : > { %p571_p12 = scmp.ne.s32.totalorder %s790_s29, %s570_s17  ;;  %s575_s19 = sshll.u32 %s701_s18, 4  ;;  %s576_s19 = int_to_ptr.vmem [resolvable:$false] %s575_s19 }
  0x21   : > { %s577_s23 = scalar_lea.vmem %s576_s19, 512  ;;  %p578_p11 = scmp.lt.s32.totalorder %s790_s29, %s576_s19 }
  0x22   : > { %p573_p0 = pnand %p571_p12, %p557_p13  ;;  %p579_p2 = scmp.lt.s32.totalorder %s577_s23, %s570_s17 }
  0x24   : > { %p574_p10 = pneg %p573_p0  ;;  %p580_p3 = por %p579_p2, %p578_p11 }
  0x26   : > { %p581_p4 = pnand %p580_p3, %p574_p10 }
  0x28   : > { %584 = shalt.err (!%p581_p4)
}
  0x29   : > { %483 = dma.hbm_to_vmem [thread:$0]  (!%p786_p9), %s782_s27, 256, %s790_s29, %s127_s3  }
  0x2a   : > { %p933_p1 = scmp.lt.s32.totalorder %s699_s14, 3  ;;  %p934_p5 = scmp.ge.s32.totalorder %s699_s14, 1 }
  0x2b   : > { %s455_s25 = sshll.u32 %s775_s22, 1  ;;  %s469_s26 = sshll.u32 %s695_s13, 5 }
  0x2c   : > { %p824_p6 = pnand %p934_p5, %p933_p1  ;;  %s833_s5 = scalar_lea.hbm %s927_s1, %s469_s26 }
  0x2d   : > { %s151_s6 = scalar_lea.vmem [#allocation8], %s455_s25  ;;  %s148_s27 = scalar_lea.sflag [#allocation9], %s775_s22 }
  0x2e   : > { %s935_s24 = scalar_select %p824_p6, 1, 0 }
  0x2f   : > { %s161_s7 = sshll.u32 %s151_s6, 4  ;;  %s585_s29 = scalar_lea.hbm %s833_s5, 32  ;;  %s162_s7 = int_to_ptr.vmem [resolvable:$true] %s161_s7 }
  0x30   : > { %p586_p10 = scmp.ne.s32.totalorder %s833_s5, %s585_s29  ;;  %s590_s9 = scalar_lea.hbm %s927_s1, 64 }
  0x31   : > { %p591_p12 = scmp.lt.u32.totalorder %s833_s5, %s927_s1  ;;  %p592_p0 = scmp.lt.u32.totalorder %s590_s9, %s585_s29 }
  0x32   : > { %p588_p11 = pnand %p586_p10, %p557_p13  ;;  %p594_p3 = scmp.lt.u32.totalorder %s585_s29, %s833_s5 }
  0x33   : > { %p593_p2 = por %p592_p0, %p591_p12 }
  0x34   : > { %p589_p8 = pneg %p588_p11 }
  0x35   : > { %p595_p4 = por %p594_p3, %p593_p2 }
  0x37   : > { %p596_p1 = pnand %p595_p4, %p589_p8 }
  0x39   : > { %599 = shalt.err (!%p596_p1)
}
  0x3a   : > { %s600_s22 = scalar_lea.vmem %s162_s7, 32  ;;  %s702_s19 = smov [#allocation8]  }
  0x3b   : > { %p601_p5 = scmp.ne.s32.totalorder %s162_s7, %s600_s22  ;;  %s605_s23 = sshll.u32 %s702_s19, 4  ;;  %s606_s23 = int_to_ptr.vmem [resolvable:$false] %s605_s23 }
  0x3c   : > { %s607_s25 = scalar_lea.vmem %s606_s23, 64  ;;  %p608_p7 = scmp.lt.s32.totalorder %s162_s7, %s606_s23 }
  0x3d   : > { %p603_p10 = pnand %p601_p5, %p557_p13  ;;  %p609_p6 = scmp.lt.s32.totalorder %s607_s25, %s600_s22 }
  0x3f   : > { %p604_p11 = pneg %p603_p10  ;;  %p610_p0 = por %p609_p6, %p608_p7 }
  0x41   : > { %p611_p12 = pnand %p610_p0, %p604_p11 }
  0x43   : > { %614 = shalt.err (!%p611_p12)
}
  0x44   : > { %486 = dma.hbm_to_vmem [thread:$0]  (!%p786_p9), %s833_s5, 32, %s162_s7, %s148_s27  }
  0x45   : > { %p936_p8 = scmp.ne.s32.totalorder %s935_s24, 0 }
  0x46   : > { %s172_s26 = sand.u32 (!%p936_p8), 1, %s683_s10   ;;  %p937_p13 = scmp.ne.s32.totalorder (!%p936_p8), %s931_s20, 0 }
  0x47   : > { %170 = sbr.rel (%p936_p8) target bundleno = 359 (0x167), region = 28  ;;  %s459_s28 = sshll.u32 (!%p936_p8), %s172_s26, 4 }
  0x48   : > { %s173_s4 = scalar_lea.sflag (!%p936_p8), [#allocation6], %s172_s26  ;;  %s176_s6 = scalar_lea.vmem (!%p936_p8), [#allocation5], %s459_s28 }
  0x4e   : > { %666 = dma.done.wait (%p937_p13), %s173_s4, 256  }
  0x4f   : > { %668 = vsyncadd (%p937_p13), %s173_s4, 4294967040  ;;  %s460_s29 = sshll.u32 %s172_s26, 1  ;;  %s182_s3 = scalar_lea.sflag [#allocation9], %s172_s26 }
  0x50   : > { %s185_s30 = scalar_lea.vmem [#allocation8], %s460_s29 }
  0x51   : > { %670 = dma.done.wait (%p937_p13), %s182_s3, 32  }
  0x52   : > { %672 = vsyncadd (%p937_p13), %s182_s3, 4294967264  ;;  %p208_p7 = scmp.eq.s32.totalorder %s691_s12, 0  ;;  %p212_p9 = scmp.eq.s32.totalorder %s691_s12, 1 }
  0x53   : > { %vm217_vm0 = vcmask (%p208_p7), 0   ;;  %v703_v0 = vmov (%p208_p7), 0.0  }
  0x54   : > { %216 = sbr.rel (!%p208_p7) target bundleno = 91 (0x5b), region = 40  ;;  %218 = vst.msk [vmem:[#allocation2] sm:$0x1] (%p208_p7), %vm217_vm0, %v703_v0  ;;  %219 = vst.msk [vmem:[#allocation3] sm:$0x1] (%p208_p7), %vm217_vm0, %v703_v0 }
  0x55   : > { %220 = vst.msk [vmem:[#allocation4] sm:$0x1] (%p208_p7), %vm217_vm0, %v703_v0 }
  0x5b PF: > { %v221_v1 = vld [vmem:[%s176_s6] sm:$0xff]  ;;  %v222_v2 = vld [vmem:[%s176_s6 + $0x8] sm:$0xff]  ;;  %v258_v4 = vlaneseq  ;;  %v704_v10 = vmov 0.0   ;;  %vm317_vm2 = vcmask 1040384   ;;  %vm324_vm5 = vcmask 0  }
  0x5c   : > { %v223_v3 = vld [vmem:[%s185_s30] sm:$0x3]  ;;  %v224_v5 = vrot.slane %v221_v1, 4  ;;  %v230_v6 = vrot.slane %v222_v2, 4 }
  0x5d   : > { %vm284_vm1 = vcmp.ne.s32.totalorder %v223_v3, 0  ;;  %v259_v7 = vshrl.u32 %v258_v4, 7 }
  0x5e   : > { %v225_v8 = vmax.f32 %v221_v1, %v224_v5  ;;  %v231_v9 = vmax.f32 %v222_v2, %v230_v6  ;;  %v463_v11 = vsel %vm284_vm1, 1.0, %v704_v10 }
  0x5f   : > { %v262_v12 = vsub.s32 0, %v259_v7  ;;  %v266_v13 = vsub.s32 1, %v259_v7 }
  0x60   : > { %v226_v14 = vrot.slane %v225_v8, 2  ;;  %v232_v15 = vrot.slane %v231_v9, 2 }
  0x61   : > { %v293_v16 = vrot.slane %v463_v11, %v262_v12  ;;  %v297_v17 = vrot.slane %v463_v11, %v266_v13  ;;  %v263_v31 = vrot.slane %v223_v3, %v262_v12  ;;  %v267_v32 = vrot.slane %v223_v3, %v266_v13 }
  0x62   : > { %v227_v18 = vmax.f32 %v225_v8, %v226_v14  ;;  %v233_v19 = vmax.f32 %v231_v9, %v232_v15 }
  0x63   : > { %v335_v20 = vsel %vm317_vm2, %v293_v16, 0.0  ;;  %v336_v21 = vsel %vm317_vm2, %v297_v17, 0.0  ;;  %vm268_vm3 = vcmp.eq.s32.totalorder %v259_v7, %v263_v31  ;;  %vm269_vm4 = vcmp.eq.s32.totalorder %v259_v7, %v267_v32  ;;  %v326_v31 = vld [vmem:[#allocation3] sm:$0x1] }
  0x64   : > { %v228_v22 = vrot.slane %v227_v18, 1  ;;  %v234_v23 = vrot.slane %v233_v19, 1  ;;  %v337_v24 = vadd.f32 %v336_v21, %v335_v20 }
  0x66   : > { %v229_v25 = vmax.f32 %v227_v18, %v228_v22  ;;  %v235_v26 = vmax.f32 %v233_v19, %v234_v23  ;;  %338 = vadd.xlane.f32.xlu1 %v337_v24 }
  0x68   : > { %v236_v27 = vsub.f32 %v221_v1, %v229_v25  ;;  %v237_v28 = vsub.f32 %v222_v2, %v235_v26  ;;  %v334_v25 = vld [vmem:[#allocation4] sm:$0x1] }
  0x6a   : > { %v238_v29 = vmul.f32 1.442695, %v236_v27  ;;  %v240_v30 = vmul.f32 1.442695, %v237_v28  ;;  %v270_v33 = vsel %vm268_vm3, %v236_v27, 0.0  ;;  %v271_v35 = vsel %vm269_vm4, %v237_v28, 0.0 }
  0x6b   : > { %v272_v39 = vrot.slane %v270_v33, 4  ;;  %v278_v41 = vrot.slane %v271_v35, 4  ;;  %v316_v28 = vld [vmem:[#allocation2] sm:$0x1] }
  0x6c   : > { %541 = vpow2.f32 %v238_v29 }
  0x6d   : > { %543 = vpow2.f32 %v240_v30  ;;  %v273_v45 = vadd.f32 %v272_v39, %v270_v33  ;;  %v279_v47 = vadd.f32 %v278_v41, %v271_v35 }
  0x6f   : > { %v274_v51 = vrot.slane %v273_v45, 2  ;;  %v280_v53 = vrot.slane %v279_v47, 2 }
  0x71   : > { %v275_v55 = vadd.f32 %v274_v51, %v273_v45  ;;  %v281_v56 = vadd.f32 %v280_v53, %v279_v47 }
  0x73   : > { %v276_v57 = vrot.slane %v275_v55, 1  ;;  %v282_v58 = vrot.slane %v281_v56, 1 }
  0x75   : > { %v277_v59 = vadd.f32 %v276_v57, %v275_v55  ;;  %v283_v61 = vadd.f32 %v282_v58, %v281_v56 }
  0x76   : > { %v542_v34 = vpop.eup %541 }
  0x77   : > { %v544_v36 = vpop.eup %543  ;;  %v242_v37 = vrot.slane %v542_v34, 4 }
  0x78   : > { %v248_v38 = vrot.slane %v544_v36, 4 }
  0x79   : > { %v243_v40 = vadd.f32 %v542_v34, %v242_v37 }
  0x7a   : > { %v249_v42 = vadd.f32 %v544_v36, %v248_v38 }
  0x7b   : > { %v244_v43 = vrot.slane %v243_v40, 2 }
  0x7c   : > { %v250_v44 = vrot.slane %v249_v42, 2 }
  0x7d   : > { %v245_v46 = vadd.f32 %v244_v43, %v243_v40 }
  0x7e   : > { %v251_v48 = vadd.f32 %v250_v44, %v249_v42 }
  0x7f   : > { %v246_v49 = vrot.slane %v245_v46, 1 }
  0x80   : > { %v252_v50 = vrot.slane %v251_v48, 1 }
  0x81   : > { %v247_v52 = vadd.f32 %v246_v49, %v245_v46 }
  0x82   : > { %v253_v54 = vadd.f32 %v252_v50, %v251_v48 }
  0x83   : > { %545 = vlog2.f32 %v247_v52 }
  0x84   : > { %547 = vlog2.f32 %v253_v54 }
  0x8d   : > { %v546_v60 = vpop.eup %545 }
  0x8e   : > { %v548_v62 = vpop.eup %547  ;;  %v255_v63 = vmul.f32 0.6931472, %v546_v60 }
  0x8f   : > { %v257_v0 = vmul.f32 0.6931472, %v548_v62 }
  0x90   : > { %v287_v1 = vsub.f32 %v255_v63, %v277_v59 }
  0x91   : > { %v288_v2 = vsub.f32 %v257_v0, %v283_v61 }
  0x92   : > { %v300_v3 = vmul.f32 %v293_v16, %v287_v1 }
  0x93   : > { %v301_v4 = vmul.f32 %v297_v17, %v288_v2 }
  0x94   : > { %v318_v5 = vsel %vm317_vm2, %v300_v3, 0.0  ;;  %v302_v6 = vsub.f32 0.0, %v300_v3 }
  0x95   : > { %v303_v7 = vsub.f32 0.0, %v301_v4  ;;  %v319_v8 = vsel %vm317_vm2, %v301_v4, 0.0 }
  0x96   : > { %v320_v9 = vadd.f32 %v319_v8, %v318_v5  ;;  %v304_v10 = vmul.f32 1.442695, %v302_v6 }
  0x97   : > { %v306_v11 = vmul.f32 1.442695, %v303_v7 }
  0x98   : > { %321 = vadd.xlane.f32.xlu0 %v320_v9  ;;  %549 = vpow2.f32 %v304_v10 }
  0x99   : > { %551 = vpow2.f32 %v306_v11 }
  0xa2   : > { %v550_v12 = vpop.eup %549 }
  0xa3   : > { %v552_v13 = vpop.eup %551  ;;  %v308_v14 = vsub.f32 1.0, %v550_v12 }
  0xa4   : > { %v309_v15 = vsub.f32 1.0, %v552_v13 }
  0xa5   : > { %v310_v18 = vmax.f32 %v308_v14, 0.0 }
  0xa6   : > { %v311_v19 = vmax.f32 %v309_v15, 0.0 }
  0xa7   : > { %v312_v16 = vmul.f32 %v310_v18, %v310_v18 }
  0xa8   : > { %v313_v17 = vmul.f32 %v311_v19, %v311_v19 }
  0xa9   : > { %v314_v20 = vmul.f32 %v312_v16, %v300_v3 }
  0xaa   : > { %v315_v21 = vmul.f32 %v313_v17, %v301_v4 }
  0xab   : > { %v327_v22 = vsel %vm317_vm2, %v314_v20, 0.0 }
  0xac   : > { %v328_v23 = vsel %vm317_vm2, %v315_v21, 0.0 }
  0xad   : > { %v329_v24 = vadd.f32 %v328_v23, %v327_v22 }
  0xaf   : > { %330 = vadd.xlane.f32.xlu0 %v329_v24 }
  0xf3   : > { %v339_v26 = vpop.xlane.xlu1 %338 }
  0xf4   : > { %v340_v27 = vadd.f32 %v339_v26, %v334_v25 }
  0xf6   : > { %341 = vst.msk [vmem:[#allocation4] sm:$0x1] %vm324_vm5, %v340_v27 }
  0xfd   : > { %v345_v34 = vld [vmem:[#allocation4] sm:$0x1] (%p212_p9) }
  0xfe   : > { %553 = vrcp.f32 (%p212_p9), %v345_v34 }
 0x108   : > { %v554_v38 = vpop.eup (%p212_p9), %553 }
 0x125   : > { %v322_v29 = vpop.xlane.xlu0 %321 }
 0x126   : > { %v323_v30 = vadd.f32 %v322_v29, %v316_v28 }
 0x128   : > { %325 = vst.msk [vmem:[#allocation2] sm:$0x1] %vm324_vm5, %v323_v30 }
 0x12f   : > { %v344_v37 = vld [vmem:[#allocation2] sm:$0x1] (%p212_p9) }
 0x130   : > { %v347_v39 = vmul.f32 (%p212_p9), %v554_v38, %v344_v37 }
 0x132   : > { %v350_v41 = vmul.f32 (%p212_p9), 0.7, %v347_v39 }
 0x139   : > { %343 = sbr.rel (!%p212_p9) target bundleno = 334 (0x14e), region = 44 }
 0x13c   : > { %v331_v32 = vpop.xlane.xlu0 %330 }
 0x13d   : > { %v332_v33 = vadd.f32 %v331_v32, %v326_v31 }
 0x13f   : > { %333 = vst.msk [vmem:[#allocation3] sm:$0x1] %vm324_vm5, %v332_v33 }
 0x146   : > { %v348_v35 = vld [vmem:[#allocation3] sm:$0x1] }
 0x147   : > { %v349_v36 = vmul.f32 0.001953125, %v348_v35 }
 0x149   : > { %v351_v40 = vmul.f32 0.3, %v349_v36 }
 0x14b   : > { %v352_v42 = vadd.f32 %v351_v40, %v350_v41 }
 0x14d   : > { %353 = vst.msk [vmem:[#allocation10] sm:$0x1] %vm324_vm5, %v352_v42 }
 0x14e PF: > { %p882_p6 = scmp.eq.s32.totalorder %s449_s15, 1  ;;  %s705_s12 = smov [#allocation10]  }
 0x14f   : > { %s361_s24 = sshll.u32 %s705_s12, 4  ;;  %s362_s24 = int_to_ptr.vmem [resolvable:$true] %s361_s24 }
 0x150   : > { %s615_s5 = scalar_lea.vmem %s362_s24, 16  ;;  %s621_s7 = scalar_lea.vmem %s362_s24, 32 }
 0x151   : > { %p616_p2 = scmp.ne.s32.totalorder %s362_s24, %s615_s5  ;;  %p622_p1 = scmp.lt.s32.totalorder %s362_s24, %s362_s24 }
 0x152   : > { %p623_p5 = scmp.lt.s32.totalorder %s621_s7, %s615_s5 }
 0x153   : > { %p617_p3 = pnand %p616_p2, %p882_p6 }
 0x154   : > { %p624_p10 = por %p623_p5, %p622_p1 }
 0x155   : > { %p618_p4 = pneg %p617_p3 }
 0x157   : > { %p625_p11 = pnand %p624_p10, %p618_p4 }
 0x159   : > { %628 = shalt.err (!%p625_p11)
}
 0x15a   : > { %s629_s8 = scalar_lea.hbm %s928_s2, 16 }
 0x15b   : > { %p630_p0 = scmp.ne.s32.totalorder %s928_s2, %s629_s8  ;;  %p635_p13 = scmp.lt.u32.totalorder %s629_s8, %s928_s2 }
 0x15d   : > { %p631_p12 = pnand %p630_p0, %p882_p6 }
 0x15f   : > { %p632_p8 = pneg %p631_p12 }
 0x161   : > { %p637_p7 = pnand %p635_p13, %p632_p8 }
 0x163   : > { %640 = shalt.err (!%p637_p7)
}
 0x164   : > { %477 = dma.vmem_to_hbm [thread:$0]  (%p882_p6), %s362_s24, 16, %s928_s2, [#allocation7]  }
 0x165   : > { %674 = dma.done.wait (%p882_p6), [#allocation7], 16  }
 0x166   : > { %676 = vsyncadd (%p882_p6), [#allocation7], 4294967280 }
 0x167 PF: > { %s19_s14 = sadd.s32 1, %s699_s14   ;;  %s939_s9 = smov %s683_s10 }
 0x168   : > { %p16_p9 = scmp.ge.s32.totalorder %s19_s14, 4   ;;  %s940_s10 = smov %s687_s11 }
 0x169   : > { %s941_s11 = smov %s772_s21  ;;  %s942_s12 = smov %s695_s13 }
 0x16a   : > { %s943_s13 = smov %s945_s16  ;;  %18 = sbr.rel (!%p16_p9) target bundleno = 7 (0x7), region = 86 }
 0x171   :  { %374 = vsyncpa [#allocation6], 1 }
 0x172   :  { %376 = vsyncpa [#allocation6 + $0x1], 1 }
 0x173   :  { %377 = vsyncpa [#allocation9], 1 }
 0x174   :  { %379 = vsyncpa [#allocation9 + $0x1], 1 }
 0x175   :  { %380 = vsyncpa [#allocation7], 1 }
 0x176   :  { %382 = vsyncpa [#allocation7 + $0x1], 1 }

</bundles_post_ra>
